<compile_context>
chip_gen: v7x
topology: tpu7x:2x2x1
jax: 0.10.0
libtpu: 0.0.40
codegen_flags: <defaults>
</compile_context>

<pallas_src>
import numpy as np

import jax
import jax.numpy as jnp
from jax.experimental import pallas as pl
from jax.experimental.pallas import tpu as pltpu

# ---- Sensor hyper-parameters (EventSensor.__init__ defaults) ----------------
BIT = 10
BLACK_LEVEL = 64.0
READ_NOISE_STD = 0.5
SHOT_NOISE_STD_ALPHA = 0.4
SHOT_NOISE_STD_BETA = 0.0  # == 0 -> shot_std^2 = alpha^2 * max(x - black, 0)
ISO_BASE = 100.0
WHITE_LEVEL = float(2 ** BIT - 1 - BLACK_LEVEL)  # 959.0
INV_WHITE_LEVEL = 1.0 / WHITE_LEVEL


def _sensor_kernel(img_ref, noise_ref, shot_ref, read_ref, out_ref):
    """Elementwise sensor-noise + black-level-compensation on one slab tile.

    img_ref   : VMEM (block_rows, lane) f32  raw N-bit pixels
    noise_ref : VMEM (block_rows, lane) f32  standard-normal samples
    shot_ref  : VMEM (block_rows, 1)    f32  alpha^2 * gain   (per row)
    read_ref  : VMEM (block_rows, 1)    f32  read^2 * gain^2  (per row)
    out_ref   : VMEM (block_rows, lane) f32  BLC output
    """
    x = img_ref[...]
    z = noise_ref[...]

    # noise_var = alpha^2 * max(x - black, 0) * gain + read^2 * gain^2
    noise_var = shot_ref[...] * jnp.maximum(x - BLACK_LEVEL, 0.0) + read_ref[...]
    noise_std = jnp.sqrt(noise_var)

    # quantize + clip to [0, 2^bit - 1 - black]  (matches torch.clip / round)
    noisy_nbit = jnp.round(jnp.clip(x + z * noise_std, 0.0, WHITE_LEVEL))

    # ISP: BlackLevelCompensation -> (img - black) / (2^bit - 1 - black)
    out_ref[...] = (noisy_nbit - BLACK_LEVEL) * INV_WHITE_LEVEL


def _pick_lane(chw):
    for lane in (1024, 512, 256, 128):
        if chw % lane == 0:
            return lane
    return 128  # will pad


def _pick_block_rows(total_rows, lane, target_bytes=2 << 20):
    """Largest multiple-of-8 divisor of total_rows with block bytes <= target."""
    target_rows = max(8, target_bytes // (lane * 4))
    best = 0
    d = 8
    while d <= min(total_rows, target_rows):
        if total_rows % d == 0:
            best = d
        d += 8
    # Fallback: full sublane extent (always a legal block shape).
    return best if best else total_rows


def event_sensor_forward(img_nbit, iso, key=None, seed=0):
    """Pallas equivalent of Sensor.forward(img_nbit, iso) (inherited by EventSensor).

    Args:
        img_nbit: (B, C, H, W) float32, range [~black_level, 2**bit - 1]
        iso:      (B,) float32, ISO <= 400
        key:      optional jax PRNG key for the Gaussian noise
        seed:     int seed used if key is None

    Returns:
        (B, C, H, W) float32 (black-level compensated; range ~[-black/white, 1])
    """
    # ISO precondition: only check when iso is concrete (doesn't break jit,
    # doesn't force a device sync inside a traced launch path).
    try:
        iso_np = np.asarray(iso)
    except Exception:  # tracer under jit -> skip host-side check
        iso_np = None
    if iso_np is not None and np.any(iso_np > 400):
        raise ValueError(
            f"Currently noise model only works for low ISO <= 400, got {iso}"
        )

    B, C, H, W = img_nbit.shape
    chw = C * H * W

    lane = _pick_lane(chw)
    pad = (-chw) % lane
    chw_p = chw + pad
    rows_per_img = chw_p // lane
    total_rows = B * rows_per_img
    block_rows = _pick_block_rows(total_rows, lane)
    grid = (total_rows // block_rows,)

    # ---- host-side layout plumbing ------------------------------------
    x = img_nbit.reshape(B, chw).astype(jnp.float32)
    if pad:
        x = jnp.pad(x, ((0, 0), (0, pad)), constant_values=BLACK_LEVEL)
    x2 = x.reshape(total_rows, lane)

    gain = jnp.asarray(iso, dtype=jnp.float32) / ISO_BASE              # (B,)
    shot_coef = (SHOT_NOISE_STD_ALPHA ** 2) * gain                     # (B,)
    read_coef = (READ_NOISE_STD ** 2) * gain * gain                    # (B,)
    shot_row = jnp.repeat(shot_coef, rows_per_img).reshape(total_rows, 1)
    read_row = jnp.repeat(read_coef, rows_per_img).reshape(total_rows, 1)

    if key is None:
        key = jax.random.PRNGKey(seed)
    z2 = jax.random.normal(key, (total_rows, lane), dtype=jnp.float32)

    # ---- pallas launch --------------------------------------------------
    out2 = pl.pallas_call(
        _sensor_kernel,
        out_shape=jax.ShapeDtypeStruct((total_rows, lane), jnp.float32),
        grid=grid,
        in_specs=[
            pl.BlockSpec((block_rows, lane), lambda r: (r, 0)),
            pl.BlockSpec((block_rows, lane), lambda r: (r, 0)),
            pl.BlockSpec((block_rows, 1), lambda r: (r, 0)),
            pl.BlockSpec((block_rows, 1), lambda r: (r, 0)),
        ],
        out_specs=pl.BlockSpec((block_rows, lane), lambda r: (r, 0)),
        compiler_params=pltpu.CompilerParams(
            dimension_semantics=("parallel",),
        ),
    )(x2, z2, shot_row, read_row)

    out = out2.reshape(B, chw_p)[:, :chw].reshape(B, C, H, W)
    return out


if __name__ == "__main__":
    key = jax.random.PRNGKey(0)
    k_img, k_iso, k_noise = jax.random.split(key, 3)

    B, C, H, W = 2, 3, 16, 16
    # raw N-bit image in [black_level, 2**bit - 1]
    img_nbit = jax.random.uniform(
        k_img, (B, C, H, W), dtype=jnp.float32,
        minval=BLACK_LEVEL, maxval=float(2 ** BIT - 1),
    )
    iso = jax.random.uniform(k_iso, (B,), dtype=jnp.float32, minval=100.0, maxval=400.0)

    out = event_sensor_forward(img_nbit, iso, key=k_noise)
    out = jax.block_until_ready(out)

    assert out.shape == (B, C, H, W)
    assert out.dtype == jnp.float32
    assert bool(jnp.all(jnp.isfinite(out)))
    assert bool(jnp.all(out >= -BLACK_LEVEL / WHITE_LEVEL - 1e-6))
    assert bool(jnp.all(out <= 1.0 + 1e-6))
    print("KERNEL_OK")
</pallas_src>

<mosaic_0001>
module attributes {stable_mosaic.version = 11 : i64} {
  func.func @_sensor_kernel(%arg0: i32, %arg1: memref<6x256xf32, #tpu.memory_space<vmem>>, %arg2: memref<6x256xf32, #tpu.memory_space<vmem>>, %arg3: memref<6x1xf32, #tpu.memory_space<vmem>>, %arg4: memref<6x1xf32, #tpu.memory_space<vmem>>, %arg5: memref<6x256xf32, #tpu.memory_space<vmem>>) attributes {dimension_semantics = [#tpu.dimension_semantics<parallel>], iteration_bounds = array<i64: 1>, scalar_prefetch = 0 : i64, scratch_operands = 0 : i64, tpu.core_type = #tpu.core_type<tc>, window_params = [{transform_indices = @transform_0, window_bounds = array<i64: 6, 256>}, {transform_indices = @transform_1, window_bounds = array<i64: 6, 256>}, {transform_indices = @transform_2, window_bounds = array<i64: 6, 1>}, {transform_indices = @transform_3, window_bounds = array<i64: 6, 1>}, {transform_indices = @transform_4, window_bounds = array<i64: 6, 256>}]} {
    %c0 = arith.constant 0 : index
    %c0_0 = arith.constant 0 : index
    %0 = vector.load %arg1[%c0, %c0_0] : memref<6x256xf32, #tpu.memory_space<vmem>>, vector<6x256xf32>
    %c0_1 = arith.constant 0 : index
    %c0_2 = arith.constant 0 : index
    %1 = vector.load %arg2[%c0_1, %c0_2] : memref<6x256xf32, #tpu.memory_space<vmem>>, vector<6x256xf32>
    %c0_3 = arith.constant 0 : index
    %c0_4 = arith.constant 0 : index
    %2 = vector.load %arg3[%c0_3, %c0_4] : memref<6x1xf32, #tpu.memory_space<vmem>>, vector<6x1xf32>
    %cst = arith.constant 6.400000e+01 : f32
    %3 = vector.broadcast %cst : f32 to vector<6x256xf32>
    %4 = arith.subf %0, %3 : vector<6x256xf32>
    %cst_5 = arith.constant 0.000000e+00 : f32
    %5 = vector.broadcast %cst_5 : f32 to vector<6x256xf32>
    %6 = arith.maximumf %4, %5 : vector<6x256xf32>
    %7 = vector.broadcast %2 : vector<6x1xf32> to vector<6x256xf32>
    %8 = arith.mulf %7, %6 : vector<6x256xf32>
    %c0_6 = arith.constant 0 : index
    %c0_7 = arith.constant 0 : index
    %9 = vector.load %arg4[%c0_6, %c0_7] : memref<6x1xf32, #tpu.memory_space<vmem>>, vector<6x1xf32>
    %10 = vector.broadcast %9 : vector<6x1xf32> to vector<6x256xf32>
    %11 = arith.addf %8, %10 : vector<6x256xf32>
    %12 = math.sqrt %11 : vector<6x256xf32>
    %13 = arith.mulf %1, %12 : vector<6x256xf32>
    %14 = arith.addf %0, %13 : vector<6x256xf32>
    %cst_8 = arith.constant 0.000000e+00 : f32
    %cst_9 = arith.constant 9.590000e+02 : f32
    %15 = vector.broadcast %cst_8 : f32 to vector<6x256xf32>
    %16 = arith.maximumf %15, %14 : vector<6x256xf32>
    %17 = vector.broadcast %cst_9 : f32 to vector<6x256xf32>
    %18 = arith.minimumf %17, %16 : vector<6x256xf32>
    %19 = math.roundeven %18 : vector<6x256xf32>
    %cst_10 = arith.constant 6.400000e+01 : f32
    %20 = vector.broadcast %cst_10 : f32 to vector<6x256xf32>
    %21 = arith.subf %19, %20 : vector<6x256xf32>
    %cst_11 = arith.constant 0.00104275288 : f32
    %22 = vector.broadcast %cst_11 : f32 to vector<6x256xf32>
    %23 = arith.mulf %21, %22 : vector<6x256xf32>
    %c0_12 = arith.constant 0 : index
    %c0_13 = arith.constant 0 : index
    %24 = vector.load %arg5[%c0_12, %c0_13] : memref<6x256xf32, #tpu.memory_space<vmem>>, vector<6x256xf32>
    tpu.vector_store %arg5[%c0_12, %c0_13], %23 {strides = array<i32>} : memref<6x256xf32, #tpu.memory_space<vmem>>, vector<6x256xf32>,
    return
  }
  func.func @transform_0(%arg0: i32) -> (i32, i32) {
    %c0_i32 = arith.constant 0 : i32
    %c0_i32_0 = arith.constant 0 : i32
    return %arg0, %c0_i32 : i32, i32
  }
  func.func @transform_1(%arg0: i32) -> (i32, i32) {
    %c0_i32 = arith.constant 0 : i32
    %c0_i32_0 = arith.constant 0 : i32
    return %arg0, %c0_i32 : i32, i32
  }
  func.func @transform_2(%arg0: i32) -> (i32, i32) {
    %c0_i32 = arith.constant 0 : i32
    %c0_i32_0 = arith.constant 0 : i32
    return %arg0, %c0_i32 : i32, i32
  }
  func.func @transform_3(%arg0: i32) -> (i32, i32) {
    %c0_i32 = arith.constant 0 : i32
    %c0_i32_0 = arith.constant 0 : i32
    return %arg0, %c0_i32 : i32, i32
  }
  func.func @transform_4(%arg0: i32) -> (i32, i32) {
    %c0_i32 = arith.constant 0 : i32
    %c0_i32_0 = arith.constant 0 : i32
    return %arg0, %c0_i32 : i32, i32
  }
}

</mosaic_0001>

<bundles_post_ra>
// kernel: tpu_custom_call.1
= control target key start
LH: loop header
LB: loop body
LE: loop exit
PB: predicated region body
PF: predicated region fallthrough
CT: control target
= control target key end

     0   :  { %9 = vsyncpa [#allocation3], 0  ;;  %s225_s0 = inlined_call_operand.vmem [shape: f32[6,256], index: 0, kind: input, shape index: {}]   ;;  %s226_s1 = inlined_call_operand.hbm [shape: f32[6,256], index: 1, kind: input, shape index: {}]   ;;  %s227_s2 = inlined_call_operand.vmem [shape: f32[6,1], index: 2, kind: input, shape index: {}]   ;;  %s228_s3 = inlined_call_operand.vmem [shape: f32[6,1], index: 3, kind: input, shape index: {}]   ;;  %s229_s4 = inlined_call_operand.hbm [shape: f32[6,256], index: 4, kind: output, shape index: {}]  }
   0x1   :  { %10 = vsyncpa [#allocation4], 0  ;;  %s161_s15 = smov [#allocation2]   ;;  %s113_s19 = scalar_lea.hbm %s226_s1, 256 }
   0x2   :  { %s19_s16 = sshll.u32 %s161_s15, 4  ;;  %p114_p0 = scmp.ne.s32.totalorder %s226_s1, %s113_s19  ;;  %s20_s16 = int_to_ptr.vmem [resolvable:$true] %s19_s16 }
   0x3   :  { %p117_p1 = scmp.lt.u32.totalorder %s113_s19, %s226_s1 }
   0x5   :  { %p119_p2 = pnand %p117_p1, %p114_p0 }
   0x7   :  { %122 = shalt.err (!%p119_p2)
}
   0x8   :  { %s123_s24 = scalar_lea.vmem %s20_s16, 256  ;;  %p128_p4 = scmp.lt.s32.totalorder %s20_s16, %s20_s16 }
   0x9   :  { %p124_p3 = scmp.ne.s32.totalorder %s20_s16, %s123_s24  ;;  %p129_p5 = scmp.lt.s32.totalorder %s123_s24, %s123_s24 }
   0xb   :  { %p130_p6 = por %p129_p5, %p128_p4 }
   0xd   :  { %p131_p7 = pnand %p130_p6, %p124_p3 }
   0xf   :  { %134 = shalt.err (!%p131_p7)
}
  0x10   :  { %22 = dma.hbm_to_vmem [thread:$0]  %s226_s1, 256, %s20_s16, [#allocation3]  }
  0x11   :  { %157 = dma.done.wait [#allocation3], 256  }
  0x12   :  { %158 = vsyncadd [#allocation3], 4294967040  ;;  %v162_v0 = vmov 0   ;;  %v34_v1 = vld [vmem:[%s227_s2] sm:$0x3f] }
  0x13   :  { %108 = vset.pattern.permute.xlu0 %v162_v0  ;;  %v46_v2 = vld [vmem:[%s228_s3] sm:$0x3f]  ;;  %v31_v4 = vld [vmem:[%s225_s0 + $0x8] sm:$0x3f] }
  0x14   :  { %41 = vperm.xlu0 %108, %v34_v1   ;;  %v30_v3 = vld [vmem:[%s225_s0] sm:$0x3f]  ;;  %v100_v6 = vadd.f32 -64.0, %v31_v4  ;;  %v33_v21 = vld [vmem:[#allocation2 + $0x8] sm:$0x3f]  ;;  %s163_s0 = smov [#allocation5]  }
  0x15   :  { %v99_v5 = vadd.f32 -64.0, %v30_v3  ;;  %v32_v18 = vld [vmem:[#allocation2] sm:$0x3f]  ;;  %s90_s2 = sshll.u32 %s163_s0, 4  ;;  %s91_s2 = int_to_ptr.vmem [resolvable:$true] %s90_s2 }
  0x16   :  { %v38_v8 = vmax.f32 %v100_v6, 0.0  ;;  %s135_s3 = scalar_lea.vmem %s91_s2, 256  ;;  %p140_p9 = scmp.lt.s32.totalorder %s91_s2, %s91_s2 }
  0x17   :  { %v37_v7 = vmax.f32 %v99_v5, 0.0  ;;  %p136_p8 = scmp.ne.s32.totalorder %s91_s2, %s135_s3  ;;  %p141_p10 = scmp.lt.s32.totalorder %s135_s3, %s135_s3 }
  0x18   :  { %49 = vperm.xlu0 %108, %v46_v2  }
  0x19   :  { %p142_p11 = por %p141_p10, %p140_p9 }
  0x1b   :  { %p143_p12 = pnand %p142_p11, %p136_p8 }
  0x93   :  { %v42_v9 = vpop.permute.xlu0 %41 }
  0x94   :  { %v44_v10 = vmul.f32 %v42_v9, %v37_v7  ;;  %v45_v11 = vmul.f32 %v42_v9, %v38_v8 }
  0x97   :  { %v50_v12 = vpop.permute.xlu0 %49 }
  0x98   :  { %v52_v13 = vadd.f32 %v50_v12, %v44_v10  ;;  %v53_v14 = vadd.f32 %v50_v12, %v45_v11 }
  0x9a   :  { %109 = vrsqrt.f32 %v52_v13  ;;  %vm56_vm0 = vcmp.eq.f32.partialorder %v52_v13, inf  ;;  %v59_v19 = vand.u32 2147483648, %v52_v13  ;;  %vm58_vm1 = vcmp.eq.f32.partialorder %v52_v13, 0.0 }
  0x9b   :  { %111 = vrsqrt.f32 %v53_v14  ;;  %vm63_vm2 = vcmp.eq.f32.partialorder %v53_v14, inf  ;;  %v66_v23 = vand.u32 2147483648, %v53_v14  ;;  %vm65_vm3 = vcmp.eq.f32.partialorder %v53_v14, 0.0 }
  0xa4   :  { %v110_v15 = vpop.eup %109 }
  0xa5   :  { %v112_v16 = vpop.eup %111  ;;  %v55_v17 = vmul.f32 %v110_v15, %v52_v13 }
  0xa6   :  { %v62_v20 = vmul.f32 %v112_v16, %v53_v14 }
  0xa7   :  { %v57_v22 = vsel %vm56_vm0, %v52_v13, %v55_v17 }
  0xa8   :  { %v60_v24 = vsel %vm58_vm1, %v59_v19, %v57_v22  ;;  %v64_v25 = vsel %vm63_vm2, %v53_v14, %v62_v20 }
  0xa9   :  { %v67_v26 = vsel %vm65_vm3, %v66_v23, %v64_v25  ;;  %v68_v27 = vmul.f32 %v60_v24, %v32_v18 }
  0xaa   :  { %v69_v28 = vmul.f32 %v67_v26, %v33_v21 }
  0xab   :  { %v70_v29 = vadd.f32 %v68_v27, %v30_v3 }
  0xac   :  { %v71_v30 = vadd.f32 %v69_v28, %v31_v4 }
  0xad   :  { %v72_v31 = vmax.f32 %v70_v29, 0.0 }
  0xae   :  { %v73_v32 = vmax.f32 %v71_v30, 0.0 }
  0xaf   :  { %v74_v33 = vmin.f32 %v72_v31, 959.0 }
  0xb0   :  { %v75_v34 = vmin.f32 %v73_v32, 959.0 }
  0xb1   :  { %v103_v35 = vround.rtne.f32 %v74_v33 }
  0xb2   :  { %v104_v36 = vround.rtne.f32 %v75_v34 }
  0xb3   :  { %v101_v37 = vadd.f32 -64.0, %v103_v35 }
  0xb4   :  { %v102_v38 = vadd.f32 -64.0, %v104_v36 }
  0xb5   :  { %v80_v39 = vmul.f32 0.0010427529, %v101_v37 }
  0xb6   :  { %v81_v40 = vmul.f32 0.0010427529, %v102_v38 }
  0xb7   :  { %82 = vst [vmem:[#allocation5] sm:$0x3f] %v80_v39 }
  0xb8   :  { %83 = vst [vmem:[#allocation5 + $0x8] sm:$0x3f] %v81_v40 }
  0xb9   :  { %146 = shalt.err (!%p143_p12)
}
  0xba   :  { %s147_s10 = scalar_lea.hbm %s229_s4, 256 }
  0xbb   :  { %p148_p13 = scmp.ne.s32.totalorder %s229_s4, %s147_s10  ;;  %p151_p0 = scmp.lt.u32.totalorder %s147_s10, %s229_s4 }
  0xbd   :  { %p153_p1 = pnand %p151_p0, %p148_p13 }
  0xbf   :  { %156 = shalt.err (!%p153_p1)
}
  0xc0   :  { %93 = dma.vmem_to_hbm [thread:$0]  %s91_s2, 256, %s229_s4, [#allocation4]  }
  0xc1   :  { %159 = dma.done.wait [#allocation4], 256  }
  0xc2   :  { %160 = vsyncadd [#allocation4], 4294967040 }
  0xc3   :  { %97 = vsyncpa [#allocation3], 1 }
  0xc4   :  { %98 = vsyncpa [#allocation4], 1 }

</bundles_post_ra>
